<compile_context>
chip_gen: v6e
topology: v6e:2x2x1
jax: 0.10.0
libtpu: 0.0.40
codegen_flags: <defaults>
</compile_context>

<pallas_src>
import jax
import jax.numpy as jnp
import numpy as np
from jax.experimental import pallas as pl
from jax.experimental.pallas import tpu as pltpu


# ---------------------------------------------------------------------------
# Kernel
# ---------------------------------------------------------------------------
def encoder_kernel(x_ref, w_ref, b_ref, wg_ref, bg_ref,
                   dstart_ref, dend_ref, gstart_ref, gend_ref,
                   hnode_ref, hdag_ref, hglob_ref):
    i = pl.program_id(0)
    tm = x_ref.shape[0]
    D = hnode_ref.shape[1]
    G = hdag_ref.shape[0]
    O = hglob_ref.shape[0]

    # h_dag accumulator lives in the resident output block (constant index map).
    @pl.when(i == 0)
    def _():
        hdag_ref[...] = jnp.zeros_like(hdag_ref)

    # --- Single fused x-matmul: [tm, F] @ [F, 2D] = [h_node | h_lin] ---
    h2 = jnp.dot(x_ref[...], w_ref[...],
                 preferred_element_type=jnp.float32) + b_ref[...]
    h_node = h2[:, :D]
    h_lin = h2[:, D:]
    hnode_ref[...] = h_node

    # --- Dag segment-sum: build 0/1 indicator [G, tm] in-register, MXU matmul ---
    rows = i * tm + jax.lax.broadcasted_iota(jnp.int32, (G, tm), 1)
    ind = jnp.logical_and(rows >= dstart_ref[...],
                          rows < dend_ref[...]).astype(jnp.float32)
    hdag_ref[...] += jnp.dot(ind, h_lin, preferred_element_type=jnp.float32)

    # --- GlobalEncoder: only on the last node-tile ---
    @pl.when(i == pl.num_programs(0) - 1)
    def _():
        h_dag = hdag_ref[...]
        h_dag_lin = jnp.dot(h_dag, wg_ref[...],
                            preferred_element_type=jnp.float32) + bg_ref[...]
        cols = jax.lax.broadcasted_iota(jnp.int32, (O, G), 1)
        gind = jnp.logical_and(cols >= gstart_ref[...],
                               cols < gend_ref[...]).astype(jnp.float32)
        hglob_ref[...] = jnp.dot(gind, h_dag_lin,
                                 preferred_element_type=jnp.float32)


# ---------------------------------------------------------------------------
# Wrapper
# ---------------------------------------------------------------------------
def _fuse_params(params):
    """Fold NodeEncoder into DagEncoder and pack one [F, 2D] weight."""
    wfc, bfc = params["wfc"], params["bfc"]
    wdag_x, wdag_h, bdag = params["wdag_x"], params["wdag_h"], params["bdag"]
    w_dag_f = wdag_x + wfc @ wdag_h          # [F, D]
    b_dag_f = bdag + bfc @ wdag_h            # [1, D]
    w_all = jnp.concatenate([wfc, w_dag_f], axis=1)   # [F, 2D]
    b_all = jnp.concatenate([bfc, b_dag_f], axis=1)   # [1, 2D]
    return w_all, b_all


def encoder_network(x, ptr, obs_ptr, params, *, tile_rows=64):
    N, F = x.shape
    D = params["wfc"].shape[1]
    G = ptr.shape[0] - 1
    if obs_ptr is None:
        # PyTorch fallback: sum over all dags == a single segment [0, G].
        obs_ptr = jnp.array([0, G], dtype=jnp.int32)
    O = obs_ptr.shape[0] - 1

    tm = int(tile_rows)
    assert tm % 8 == 0, "tile_rows must be a multiple of 8"
    n_tiles = max(1, -(-N // tm))
    N_pad = n_tiles * tm

    # Pad node dim to a tile multiple; padded rows fall outside ptr[-1]==N so
    # they contribute nothing to any segment sum, and their h_node is sliced off.
    x_pad = jnp.pad(x, ((0, N_pad - N), (0, 0)))

    w_all, b_all = _fuse_params(params)
    wg, bg = params["wg"], params["bg"]

    ptr = ptr.astype(jnp.int32)
    obs_ptr = obs_ptr.astype(jnp.int32)
    dstart = ptr[:-1].reshape(G, 1)
    dend = ptr[1:].reshape(G, 1)
    gstart = obs_ptr[:-1].reshape(O, 1)
    gend = obs_ptr[1:].reshape(O, 1)

    flops = (2 * N_pad * F * (2 * D)   # fused x-matmul
             + 2 * N_pad * G * D       # dag segment-sum matmul
             + 2 * G * D * D           # global linear
             + 2 * O * G * D)          # global segment-sum
    bytes_accessed = 4 * (N_pad * F + F * 2 * D + 2 * D + D * D + D
                          + 2 * (G + O)
                          + N_pad * D + G * D + O * D)

    h_node, h_dag, h_glob = pl.pallas_call(
        encoder_kernel,
        out_shape=(
            jax.ShapeDtypeStruct((N_pad, D), jnp.float32),   # h_node (padded)
            jax.ShapeDtypeStruct((G, D), jnp.float32),       # h_dag
            jax.ShapeDtypeStruct((O, D), jnp.float32),       # h_glob
        ),
        grid=(n_tiles,),
        in_specs=[
            pl.BlockSpec((tm, F), lambda i: (i, 0)),         # x tile
            pl.BlockSpec((F, 2 * D), lambda i: (0, 0)),      # fused weight (resident)
            pl.BlockSpec((1, 2 * D), lambda i: (0, 0)),      # fused bias
            pl.BlockSpec((D, D), lambda i: (0, 0)),          # Wg
            pl.BlockSpec((1, D), lambda i: (0, 0)),          # bg
            pl.BlockSpec((G, 1), lambda i: (0, 0)),          # dag seg starts
            pl.BlockSpec((G, 1), lambda i: (0, 0)),          # dag seg ends
            pl.BlockSpec((O, 1), lambda i: (0, 0)),          # obs seg starts
            pl.BlockSpec((O, 1), lambda i: (0, 0)),          # obs seg ends
        ],
        out_specs=(
            pl.BlockSpec((tm, D), lambda i: (i, 0)),
            pl.BlockSpec((G, D), lambda i: (0, 0)),
            pl.BlockSpec((O, D), lambda i: (0, 0)),
        ),
        compiler_params=pltpu.CompilerParams(
            dimension_semantics=("arbitrary",),   # node axis reduces into h_dag
            vmem_limit_bytes=32 * 1024 * 1024,    # safe on v5e/v6e/v7x
        ),
        cost_estimate=pl.CostEstimate(flops=flops, transcendentals=0,
                                      bytes_accessed=bytes_accessed),
    )(x_pad, w_all, b_all, wg, bg, dstart, dend, gstart, gend)

    # TODO(synk): for production shapes, pad embed_dim to 128 lanes (or pack
    # independent graphs into the lane dim) for full-width stores.
    return {"node": h_node[:N], "dag": h_dag, "glob": h_glob}


# ---------------------------------------------------------------------------
# Params + pure-JAX reference (unfused, matches PyTorch forward)
# ---------------------------------------------------------------------------
def init_params(key, num_node_features, embed_dim):
    """PyTorch-style uniform(-1/sqrt(fan_in), 1/sqrt(fan_in)) init."""
    F, D = num_node_features, embed_dim
    ks = jax.random.split(key, 6)

    def u(k, shape, fan_in):
        bound = 1.0 / np.sqrt(fan_in)
        return jax.random.uniform(k, shape, jnp.float32, -bound, bound)

    wfc = u(ks[0], (F, D), F)            # NodeEncoder.fc
    bfc = u(ks[1], (1, D), F)
    wdag = u(ks[2], (F + D, D), F + D)   # DagEncoder.linear
    bdag = u(ks[3], (1, D), F + D)
    wg = u(ks[4], (D, D), D)             # GlobalEncoder.linear
    bg = u(ks[5], (1, D), D)

    return {"wfc": wfc, "bfc": bfc,
            "wdag_x": wdag[:F], "wdag_h": wdag[F:], "bdag": bdag,
            "wg": wg, "bg": bg}


def _segment_matrix(ptr, num_cols):
    starts = ptr[:-1][:, None]
    ends = ptr[1:][:, None]
    idx = jnp.arange(num_cols, dtype=ptr.dtype)[None, :]
    return ((idx >= starts) & (idx < ends)).astype(jnp.float32)


def reference(x, ptr, obs_ptr, params):
    h_node = x @ params["wfc"] + params["bfc"]
    h_cat = jnp.concatenate([x, h_node], axis=1)
    wdag = jnp.concatenate([params["wdag_x"], params["wdag_h"]], axis=0)
    h_lin = h_cat @ wdag + params["bdag"]
    h_dag = _segment_matrix(ptr, x.shape[0]) @ h_lin
    h_dag_lin = h_dag @ params["wg"] + params["bg"]
    if obs_ptr is None:
        h_glob = h_dag_lin.sum(0, keepdims=True)
    else:
        h_glob = _segment_matrix(obs_ptr, h_dag.shape[0]) @ h_dag_lin
    return {"node": h_node, "dag": h_dag, "glob": h_glob}


# ---------------------------------------------------------------------------
if __name__ == "__main__":
    num_node_features = 4
    embed_dim = 32
    num_nodes = 240        # padded to 256 = 4 tiles of 64 rows

    key = jax.random.PRNGKey(0)
    k_x, k_p = jax.random.split(key)

    x = jax.random.normal(k_x, (num_nodes, num_node_features), jnp.float32)
    # 6 DAGs over 240 nodes, 2 observations over the 6 DAGs (CSR pointers).
    ptr = jnp.array([0, 30, 75, 120, 160, 200, 240], dtype=jnp.int32)
    obs_ptr = jnp.array([0, 3, 6], dtype=jnp.int32)

    params = init_params(k_p, num_node_features, embed_dim)

    out = encoder_network(x, ptr, obs_ptr, params, tile_rows=64)
    jax.block_until_ready(out)

    ref = reference(x, ptr, obs_ptr, params)
    for k in ("node", "dag", "glob"):
        np.testing.assert_allclose(np.asarray(out[k]), np.asarray(ref[k]),
                                   rtol=1e-4, atol=1e-4)

    # obs_ptr=None fallback path (PyTorch's `except` branch).
    out2 = encoder_network(x, ptr, None, params, tile_rows=64)
    jax.block_until_ready(out2)
    ref2 = reference(x, ptr, None, params)
    np.testing.assert_allclose(np.asarray(out2["glob"]), np.asarray(ref2["glob"]),
                               rtol=1e-4, atol=1e-4)

    print("KERNEL_OK")
</pallas_src>

<mosaic_0001>
module attributes {stable_mosaic.version = 11 : i64} {
  func.func @encoder_kernel(%arg0: i32, %arg1: memref<64x4xf32, #tpu.memory_space<vmem>>, %arg2: memref<4x64xf32, #tpu.memory_space<vmem>>, %arg3: memref<1x64xf32, #tpu.memory_space<vmem>>, %arg4: memref<32x32xf32, #tpu.memory_space<vmem>>, %arg5: memref<1x32xf32, #tpu.memory_space<vmem>>, %arg6: memref<6x1xi32, #tpu.memory_space<vmem>>, %arg7: memref<6x1xi32, #tpu.memory_space<vmem>>, %arg8: memref<2x1xi32, #tpu.memory_space<vmem>>, %arg9: memref<2x1xi32, #tpu.memory_space<vmem>>, %arg10: memref<64x32xf32, #tpu.memory_space<vmem>>, %arg11: memref<6x32xf32, #tpu.memory_space<vmem>>, %arg12: memref<2x32xf32, #tpu.memory_space<vmem>>) attributes {dimension_semantics = [#tpu.dimension_semantics<arbitrary>], iteration_bounds = array<i64: 4>, scalar_prefetch = 0 : i64, scratch_operands = 0 : i64, tpu.core_type = #tpu.core_type<tc>, window_params = [{transform_indices = @transform_0, window_bounds = array<i64: 64, 4>}, {pipeline_mode = #tpu.pipeline_mode<synchronous>, transform_indices = @transform_1, window_bounds = array<i64: 4, 64>}, {pipeline_mode = #tpu.pipeline_mode<synchronous>, transform_indices = @transform_2, window_bounds = array<i64: 1, 64>}, {pipeline_mode = #tpu.pipeline_mode<synchronous>, transform_indices = @transform_3, window_bounds = array<i64: 32, 32>}, {pipeline_mode = #tpu.pipeline_mode<synchronous>, transform_indices = @transform_4, window_bounds = array<i64: 1, 32>}, {pipeline_mode = #tpu.pipeline_mode<synchronous>, transform_indices = @transform_5, window_bounds = array<i64: 6, 1>}, {pipeline_mode = #tpu.pipeline_mode<synchronous>, transform_indices = @transform_6, window_bounds = array<i64: 6, 1>}, {pipeline_mode = #tpu.pipeline_mode<synchronous>, transform_indices = @transform_7, window_bounds = array<i64: 2, 1>}, {pipeline_mode = #tpu.pipeline_mode<synchronous>, transform_indices = @transform_8, window_bounds = array<i64: 2, 1>}, {transform_indices = @transform_9, window_bounds = array<i64: 64, 32>}, {pipeline_mode = #tpu.pipeline_mode<synchronous>, transform_indices = @transform_10, window_bounds = array<i64: 6, 32>}, {pipeline_mode = #tpu.pipeline_mode<synchronous>, transform_indices = @transform_11, window_bounds = array<i64: 2, 32>}]} {
    %c0_i32 = arith.constant 0 : i32
    %0 = arith.cmpi eq, %arg0, %c0_i32 : i32
    %1 = arith.extui %0 : i1 to i32
    %c0_i32_0 = arith.constant 0 : i32
    %2 = arith.cmpi ne, %1, %c0_i32_0 : i32
    scf.if %2 {
      %cst_18 = arith.constant 0.000000e+00 : f32
      %32 = vector.broadcast %cst_18 : f32 to vector<6x32xf32>
      %c0_19 = arith.constant 0 : index
      %c0_20 = arith.constant 0 : index
      %33 = vector.load %arg11[%c0_19, %c0_20] : memref<6x32xf32, #tpu.memory_space<vmem>>, vector<6x32xf32>
      tpu.vector_store %arg11[%c0_19, %c0_20], %32 {strides = array<i32>} : memref<6x32xf32, #tpu.memory_space<vmem>>, vector<6x32xf32>,
    } else {
    }
    %c0 = arith.constant 0 : index
    %c0_1 = arith.constant 0 : index
    %3 = vector.load %arg1[%c0, %c0_1] : memref<64x4xf32, #tpu.memory_space<vmem>>, vector<64x4xf32>
    %c0_2 = arith.constant 0 : index
    %c0_3 = arith.constant 0 : index
    %4 = vector.load %arg2[%c0_2, %c0_3] : memref<4x64xf32, #tpu.memory_space<vmem>>, vector<4x64xf32>
    %cst = arith.constant dense<0.000000e+00> : vector<64x64xf32>
    %5 = tpu.matmul %3, %4, %cst {dimension_numbers = #tpu.dot_dimension_numbers<[1], [0], [0], [1], [0, 0, 1, 1], [], []>} : vector<64x4xf32>, vector<4x64xf32>, vector<64x64xf32> -> vector<64x64xf32>
    %c0_4 = arith.constant 0 : index
    %c0_5 = arith.constant 0 : index
    %6 = vector.load %arg3[%c0_4, %c0_5] : memref<1x64xf32, #tpu.memory_space<vmem>>, vector<1x64xf32>
    %7 = vector.broadcast %6 : vector<1x64xf32> to vector<64x64xf32>
    %8 = arith.addf %5, %7 : vector<64x64xf32>
    %9 = vector.extract_strided_slice %8 {offsets = [0, 0], sizes = [64, 32], strides = [1, 1]} : vector<64x64xf32> to vector<64x32xf32>
    %10 = vector.extract_strided_slice %8 {offsets = [0, 32], sizes = [64, 32], strides = [1, 1]} : vector<64x64xf32> to vector<64x32xf32>
    %c0_6 = arith.constant 0 : index
    %c0_7 = arith.constant 0 : index
    %11 = vector.load %arg10[%c0_6, %c0_7] : memref<64x32xf32, #tpu.memory_space<vmem>>, vector<64x32xf32>
    tpu.vector_store %arg10[%c0_6, %c0_7], %9 {strides = array<i32>} : memref<64x32xf32, #tpu.memory_space<vmem>>, vector<64x32xf32>,
    %c64_i32 = arith.constant 64 : i32
    %12 = arith.muli %arg0, %c64_i32 : i32
    %13 = tpu.iota {dimensions = array<i32: 1>} : vector<6x64xi32>
    %14 = vector.broadcast %12 : i32 to vector<6x64xi32>
    %15 = arith.addi %14, %13 : vector<6x64xi32>
    %c0_8 = arith.constant 0 : index
    %c0_9 = arith.constant 0 : index
    %16 = vector.load %arg6[%c0_8, %c0_9] : memref<6x1xi32, #tpu.memory_space<vmem>>, vector<6x1xi32>
    %17 = vector.broadcast %16 : vector<6x1xi32> to vector<6x64xi32>
    %18 = arith.cmpi sge, %15, %17 : vector<6x64xi32>
    %c0_10 = arith.constant 0 : index
    %c0_11 = arith.constant 0 : index
    %19 = vector.load %arg7[%c0_10, %c0_11] : memref<6x1xi32, #tpu.memory_space<vmem>>, vector<6x1xi32>
    %20 = vector.broadcast %19 : vector<6x1xi32> to vector<6x64xi32>
    %21 = arith.cmpi slt, %15, %20 : vector<6x64xi32>
    %22 = arith.andi %18, %21 : vector<6x64xi1>
    %23 = arith.extui %22 : vector<6x64xi1> to vector<6x64xi32>
    %24 = arith.sitofp %23 : vector<6x64xi32> to vector<6x64xf32>
    %c0_12 = arith.constant 0 : index
    %c0_13 = arith.constant 0 : index
    %25 = vector.load %arg11[%c0_12, %c0_13] : memref<6x32xf32, #tpu.memory_space<vmem>>, vector<6x32xf32>
    %cst_14 = arith.constant dense<0.000000e+00> : vector<6x32xf32>
    %26 = tpu.matmul %24, %10, %cst_14 {dimension_numbers = #tpu.dot_dimension_numbers<[1], [0], [0], [1], [0, 0, 1, 1], [], []>} : vector<6x64xf32>, vector<64x32xf32>, vector<6x32xf32> -> vector<6x32xf32>
    %27 = arith.addf %25, %26 : vector<6x32xf32>
    %c0_15 = arith.constant 0 : index
    %c0_16 = arith.constant 0 : index
    %28 = vector.load %arg11[%c0_15, %c0_16] : memref<6x32xf32, #tpu.memory_space<vmem>>, vector<6x32xf32>
    tpu.vector_store %arg11[%c0_15, %c0_16], %27 {strides = array<i32>} : memref<6x32xf32, #tpu.memory_space<vmem>>, vector<6x32xf32>,
    %c3_i32 = arith.constant 3 : i32
    %29 = arith.cmpi eq, %arg0, %c3_i32 : i32
    %30 = arith.extui %29 : i1 to i32
    %c0_i32_17 = arith.constant 0 : i32
    %31 = arith.cmpi ne, %30, %c0_i32_17 : i32
    scf.if %31 {
      %c0_18 = arith.constant 0 : index
      %c0_19 = arith.constant 0 : index
      %32 = vector.load %arg11[%c0_18, %c0_19] : memref<6x32xf32, #tpu.memory_space<vmem>>, vector<6x32xf32>
      %c0_20 = arith.constant 0 : index
      %c0_21 = arith.constant 0 : index
      %33 = vector.load %arg4[%c0_20, %c0_21] : memref<32x32xf32, #tpu.memory_space<vmem>>, vector<32x32xf32>
      %cst_22 = arith.constant dense<0.000000e+00> : vector<6x32xf32>
      %34 = tpu.matmul %32, %33, %cst_22 {dimension_numbers = #tpu.dot_dimension_numbers<[1], [0], [0], [1], [0, 0, 1, 1], [], []>} : vector<6x32xf32>, vector<32x32xf32>, vector<6x32xf32> -> vector<6x32xf32>
      %c0_23 = arith.constant 0 : index
      %c0_24 = arith.constant 0 : index
      %35 = vector.load %arg5[%c0_23, %c0_24] : memref<1x32xf32, #tpu.memory_space<vmem>>, vector<1x32xf32>
      %36 = vector.broadcast %35 : vector<1x32xf32> to vector<6x32xf32>
      %37 = arith.addf %34, %36 : vector<6x32xf32>
      %38 = tpu.iota {dimensions = array<i32: 1>} : vector<2x6xi32>
      %c0_25 = arith.constant 0 : index
      %c0_26 = arith.constant 0 : index
      %39 = vector.load %arg8[%c0_25, %c0_26] : memref<2x1xi32, #tpu.memory_space<vmem>>, vector<2x1xi32>
      %40 = vector.broadcast %39 : vector<2x1xi32> to vector<2x6xi32>
      %41 = arith.cmpi sge, %38, %40 : vector<2x6xi32>
      %c0_27 = arith.constant 0 : index
      %c0_28 = arith.constant 0 : index
      %42 = vector.load %arg9[%c0_27, %c0_28] : memref<2x1xi32, #tpu.memory_space<vmem>>, vector<2x1xi32>
      %43 = vector.broadcast %42 : vector<2x1xi32> to vector<2x6xi32>
      %44 = arith.cmpi slt, %38, %43 : vector<2x6xi32>
      %45 = arith.andi %41, %44 : vector<2x6xi1>
      %46 = arith.extui %45 : vector<2x6xi1> to vector<2x6xi32>
      %47 = arith.sitofp %46 : vector<2x6xi32> to vector<2x6xf32>
      %cst_29 = arith.constant dense<0.000000e+00> : vector<2x32xf32>
      %48 = tpu.matmul %47, %37, %cst_29 {dimension_numbers = #tpu.dot_dimension_numbers<[1], [0], [0], [1], [0, 0, 1, 1], [], []>} : vector<2x6xf32>, vector<6x32xf32>, vector<2x32xf32> -> vector<2x32xf32>
      %c0_30 = arith.constant 0 : index
      %c0_31 = arith.constant 0 : index
      %49 = vector.load %arg12[%c0_30, %c0_31] : memref<2x32xf32, #tpu.memory_space<vmem>>, vector<2x32xf32>
      tpu.vector_store %arg12[%c0_30, %c0_31], %48 {strides = array<i32>} : memref<2x32xf32, #tpu.memory_space<vmem>>, vector<2x32xf32>,
    } else {
    }
    return
  }
  func.func @transform_0(%arg0: i32) -> (i32, i32) {
    %c0_i32 = arith.constant 0 : i32
    %c0_i32_0 = arith.constant 0 : i32
    return %arg0, %c0_i32 : i32, i32
  }
  func.func @transform_1(%arg0: i32) -> (i32, i32) {
    %c0_i32 = arith.constant 0 : i32
    %c0_i32_0 = arith.constant 0 : i32
    %c0_i32_1 = arith.constant 0 : i32
    return %c0_i32, %c0_i32_0 : i32, i32
  }
  func.func @transform_2(%arg0: i32) -> (i32, i32) {
    %c0_i32 = arith.constant 0 : i32
    %c0_i32_0 = arith.constant 0 : i32
    %c0_i32_1 = arith.constant 0 : i32
    return %c0_i32, %c0_i32_0 : i32, i32
  }
  func.func @transform_3(%arg0: i32) -> (i32, i32) {
    %c0_i32 = arith.constant 0 : i32
    %c0_i32_0 = arith.constant 0 : i32
    %c0_i32_1 = arith.constant 0 : i32
    return %c0_i32, %c0_i32_0 : i32, i32
  }
  func.func @transform_4(%arg0: i32) -> (i32, i32) {
    %c0_i32 = arith.constant 0 : i32
    %c0_i32_0 = arith.constant 0 : i32
    %c0_i32_1 = arith.constant 0 : i32
    return %c0_i32, %c0_i32_0 : i32, i32
  }
  func.func @transform_5(%arg0: i32) -> (i32, i32) {
    %c0_i32 = arith.constant 0 : i32
    %c0_i32_0 = arith.constant 0 : i32
    %c0_i32_1 = arith.constant 0 : i32
    return %c0_i32, %c0_i32_0 : i32, i32
  }
  func.func @transform_6(%arg0: i32) -> (i32, i32) {
    %c0_i32 = arith.constant 0 : i32
    %c0_i32_0 = arith.constant 0 : i32
    %c0_i32_1 = arith.constant 0 : i32
    return %c0_i32, %c0_i32_0 : i32, i32
  }
  func.func @transform_7(%arg0: i32) -> (i32, i32) {
    %c0_i32 = arith.constant 0 : i32
    %c0_i32_0 = arith.constant 0 : i32
    %c0_i32_1 = arith.constant 0 : i32
    return %c0_i32, %c0_i32_0 : i32, i32
  }
  func.func @transform_8(%arg0: i32) -> (i32, i32) {
    %c0_i32 = arith.constant 0 : i32
    %c0_i32_0 = arith.constant 0 : i32
    %c0_i32_1 = arith.constant 0 : i32
    return %c0_i32, %c0_i32_0 : i32, i32
  }
  func.func @transform_9(%arg0: i32) -> (i32, i32) {
    %c0_i32 = arith.constant 0 : i32
    %c0_i32_0 = arith.constant 0 : i32
    return %arg0, %c0_i32 : i32, i32
  }
  func.func @transform_10(%arg0: i32) -> (i32, i32) {
    %c0_i32 = arith.constant 0 : i32
    %c0_i32_0 = arith.constant 0 : i32
    %c0_i32_1 = arith.constant 0 : i32
    return %c0_i32, %c0_i32_0 : i32, i32
  }
  func.func @transform_11(%arg0: i32) -> (i32, i32) {
    %c0_i32 = arith.constant 0 : i32
    %c0_i32_0 = arith.constant 0 : i32
    %c0_i32_1 = arith.constant 0 : i32
    return %c0_i32, %c0_i32_0 : i32, i32
  }
}

</mosaic_0001>

<bundles_post_ra>
// kernel: tpu_custom_call.1
= control target key start
LH: loop header
LB: loop body
LE: loop exit
PB: predicated region body
PF: predicated region fallthrough
CT: control target
= control target key end

     0   :  { %17 = vsyncpa [#allocation3], 0  ;;  %s1356_s0 = inlined_call_operand.vmem [shape: f32[256,4], index: 0, kind: input, shape index: {}]   ;;  %s1357_s1 = inlined_call_operand.vmem [shape: f32[4,64], index: 1, kind: input, shape index: {}]   ;;  %s1358_s2 = inlined_call_operand.vmem [shape: f32[1,64], index: 2, kind: input, shape index: {}]   ;;  %s1359_s3 = inlined_call_operand.vmem [shape: f32[32,32], index: 3, kind: input, shape index: {}]   ;;  %s1360_s4 = inlined_call_operand.vmem [shape: f32[1,32], index: 4, kind: input, shape index: {}]   ;;  %s1361_s5 = inlined_call_operand.vmem [shape: s32[6,1], index: 5, kind: input, shape index: {}]   ;;  %s1362_s6 = inlined_call_operand.vmem [shape: s32[6,1], index: 6, kind: input, shape index: {}]   ;;  %s1363_s7 = inlined_call_operand.vmem [shape: s32[2,1], index: 7, kind: input, shape index: {}]   ;;  %s1364_s8 = inlined_call_operand.vmem [shape: s32[2,1], index: 8, kind: input, shape index: {}]   ;;  %s1365_s9 = inlined_call_operand.vmem [shape: f32[256,32], index: 9, kind: output, shape index: {0}]   ;;  %s1366_s10 = inlined_call_operand.hbm [shape: f32[6,32], index: 10, kind: output, shape index: {1}]   ;;  %s1367_s11 = inlined_call_operand.hbm [shape: f32[2,32], index: 11, kind: output, shape index: {2}]  }
   0x1   :  { %18 = vsyncpa [#allocation5], 0  ;;  %s1240_s17 = smov 0  }
   0x2 LB: > { %s1246_s18 = sadd.s32 4294967295, %s1168_s17   ;;  %p968_p0 = scmp.ge.s32.totalorder %s1168_s17, 1  ;;  %s1168_s17 = sphi %s1240_s17, %s24_s17  }
   0x3   : > { %p335_p1 = scmp.lt.s32.totalorder %s1168_s17, 5 }
   0x5   : > { %p336_p2 = pnand %p968_p0, %p335_p1 }
   0x6   : > { %s969_s19 = sshll.u32 (!%p336_p2), %s1246_s18, 3  ;;  %p973_p4 = scmp.ne.s32.totalorder (!%p336_p2), %s1246_s18, 0 }
   0x7   : > { %339 = sbr.rel (%p336_p2) target bundleno = 994 (0x3e2), region = 56  ;;  %p376_p3 = scmp.lt.s32.totalorder (!%p336_p2), %s969_s19, 31 }
   0xc   : > { %s1369_s19 = smov (!%p376_p3, %s969_s19), 31  ;;  %390 = sbr.rel (%p973_p4) target bundleno = 19 (0x13), region = 60 }
   0xd   : > { %s970_s20 = sshll.u32 %s1369_s19, 3 }
   0xe   : > { %s379_s23 = scalar_lea.vmem %s1356_s0, %s970_s20  ;;  %s1257_s26 = scalar_lea.vmem %s1365_s9, %s970_s20 }
  0x11   : > { %vm391_vm0 = vcmask 259072   ;;  %v1170_v0 = vmov 0.0  }
  0x12   : > { %392 = vst.msk [vmem:[#allocation2] sm:$0x3f] %vm391_vm0, %v1170_v0 }
  0x13 PF: > { %v401_v1 = vld [vmem:[%s1357_s1] sm:$0xf]  ;;  %vm434_vm1 = vcmask 1043456   ;;  %vm409_vm2 = vcmask 31744   ;;  %v394_v3 = vld [vmem:[%s379_s23 + $0x8] sm:$0xff]  ;;  %v395_v4 = vld [vmem:[%s379_s23 + $0x10] sm:$0xff]  ;;  %v553_v35 = vlaneseq }
  0x14   : > { %v393_v2 = vld [vmem:[%s379_s23] sm:$0xff]  ;;  %1024 = vmatprep.subr.msk.mxu0 %vm434_vm1, %v401_v1  ;;  %v396_v5 = vld [vmem:[%s379_s23 + $0x18] sm:$0xff]  ;;  %v398_v7 = vld [vmem:[%s379_s23 + $0x28] sm:$0xff]  ;;  %v1171_v10 = vmov 0   ;;  %v1172_v12 = vmov 0.0   ;;  %vm543_vm3 = vcmask 261120  }
  0x15   : > { %1026 = vmatprep.mubr.msk.f32.mxu0 %vm409_vm2, %v393_v2  ;;  %1025 = vmatpush3.msk.msra.mxu0 %vm434_vm1, %v401_v1  ;;  %v397_v6 = vld [vmem:[%s379_s23 + $0x20] sm:$0xff]  ;;  %v399_v8 = vld [vmem:[%s379_s23 + $0x30] sm:$0xff]  ;;  %v400_v9 = vld [vmem:[%s379_s23 + $0x38] sm:$0xff]  ;;  %s1173_s12 = smov 96   ;;  %vm1174_vm4 = vmmov 0   ;;  %s984_s19 = sshll.u32 %s1246_s18, 6 }
  0x16   : > { %1027 = vmatmul.mubr.msk.f32.vlgmr.msra.gmra.mxu0 %vm409_vm2, %v394_v3  ;;  %1104 = vset.pattern.permute.xlu1 %v1171_v10  ;;  %v974_v11 = vld [vmem:[%s1358_s2] ss:$0 sm:$0xff]  ;;  %v554_v37 = vand.u32 127, %v553_v35  ;;  %v555_v38 = vstv %s984_s19  ;;  %vm603_vm8 = vcmask 523264   ;;  %vm678_vm9 = vcmask 259072   ;;  %p987_p5 = scmp.ne.s32.totalorder %s1246_s18, 3 }
  0x17   : > { %1029 = vmatprep.mubr.msk.f32.mxu0 %vm409_vm2, %v395_v4  ;;  %1103 = vset.pattern.permute.xlu0 %v1171_v10  ;;  %v562_v29 = vld [vmem:[%s1362_s6] sm:$0x3f] }
  0x18   : > { %1038 = vmatprep.subr.mxu1 %v1172_v12  ;;  %v557_v30 = vld [vmem:[%s1361_s5] sm:$0x3f]  ;;  %1054 = vmatprep.mubr.msk.f32.mxu1 %vm1174_vm4, %v1172_v12  ;;  %v556_v41 = vadd.s32 %v555_v38, %v554_v37 }
  0x19   : > { %v570_v46 = vld [vmem:[#allocation2] sm:$0x3f] }
  0x1a   : > { %1030 = vmatmul.mubr.msk.f32.gmra.mxu0 %vm409_vm2, %v396_v5 }
  0x1b   : > { %1032 = vmatprep.mubr.msk.f32.mxu0 %vm409_vm2, %v397_v6 }
  0x1e   : > { %1033 = vmatmul.mubr.msk.f32.gmra.mxu0 %vm409_vm2, %v398_v7 }
  0x1f   : > { %1035 = vmatprep.mubr.msk.f32.mxu0 %vm409_vm2, %v399_v8 }
  0x22   : > { %1036 = vmatmul.mubr.msk.f32.gmra.mxu0 %vm409_vm2, %v400_v9 }
  0xd6   : > { %v1028_v13 = vpop.f32.mrf.mxu0 }
  0xd7   : > { %v510_v14 = vadd.f32 %v1028_v13, %v974_v11 }
  0xd8   : > { %v504_v15 = vpop.f32.mrf.mxu0 }
  0xd9   : > { %545 = vst.msk [vmem:[%s1257_s26 + $0x8] sm:$0xff] %vm543_vm3, %v510_v14  ;;  %v505_v16 = vadd.f32 %v974_v11, %v504_v15 }
  0xda   : > { %v1031_v17 = vpop.f32.mrf.mxu0 }
  0xdb   : > { %544 = vst.msk [vmem:[%s1257_s26] sm:$0xff] %vm543_vm3, %v505_v16  ;;  %v520_v18 = vadd.f32 %v1031_v17, %v974_v11 }
  0xdc   : > { %v514_v19 = vpop.f32.mrf.mxu0 }
  0xdd   : > { %547 = vst.msk [vmem:[%s1257_s26 + $0x18] sm:$0xff] %vm543_vm3, %v520_v18  ;;  %v515_v20 = vadd.f32 %v974_v11, %v514_v19 }
  0xde   : > { %v1034_v21 = vpop.f32.mrf.mxu0 }
  0xdf   : > { %546 = vst.msk [vmem:[%s1257_s26 + $0x10] sm:$0xff] %vm543_vm3, %v515_v20  ;;  %v530_v22 = vadd.f32 %v1034_v21, %v974_v11 }
  0xe0   : > { %v524_v23 = vpop.f32.mrf.mxu0 }
  0xe1   : > { %549 = vst.msk [vmem:[%s1257_s26 + $0x28] sm:$0xff] %vm543_vm3, %v530_v22  ;;  %v525_v24 = vadd.f32 %v974_v11, %v524_v23  ;;  %589 = vrot.lane.b32.xlu1 %v530_v22, %s1173_s12 }
  0xe2   : > { %v1037_v25 = vpop.f32.mrf.mxu0 }
  0xe3   : > { %548 = vst.msk [vmem:[%s1257_s26 + $0x20] sm:$0xff] %vm543_vm3, %v525_v24  ;;  %v540_v26 = vadd.f32 %v1037_v25, %v974_v11 }
  0xe4   : > { %v534_v27 = vpop.f32.mrf.mxu0 }
  0xe5   : > { %551 = vst.msk [vmem:[%s1257_s26 + $0x38] sm:$0xff] %vm543_vm3, %v540_v26  ;;  %v535_v28 = vadd.f32 %v974_v11, %v534_v27  ;;  %593 = vrot.lane.b32.xlu0 %v540_v26, %s1173_s12  ;;  %587 = vrot.lane.b32.xlu1 %v525_v24, %s1173_s12 }
  0xe7   : > { %550 = vst.msk [vmem:[%s1257_s26 + $0x30] sm:$0xff] %vm543_vm3, %v535_v28 }
  0xe9   : > { %591 = vrot.lane.b32.xlu0 %v535_v28, %s1173_s12  ;;  %564 = vperm.xlu1 %1104, %v562_v29  }
  0xed   : > { %559 = vperm.xlu0 %1103, %v557_v30   ;;  %585 = vrot.lane.b32.xlu1 %v520_v18, %s1173_s12 }
  0xf1   : > { %581 = vrot.lane.b32.xlu1 %v510_v14, %s1173_s12  ;;  %583 = vrot.lane.b32.xlu0 %v515_v20, %s1173_s12 }
  0xf5   : > { %579 = vrot.lane.b32.xlu0 %v505_v16, %s1173_s12 }
 0x153   : > { %v590_v32 = vpop.permute.xlu1 %589 }
 0x157   : > { %v594_v31 = vpop.permute.xlu0 %593  ;;  %v588_v34 = vpop.permute.xlu1 %587 }
 0x158   : > { %1039 = vmatpush3.msra.mxu1 %v594_v31 }
 0x159   : > { %1040 = vmatprep.subr.mxu1 %v1172_v12 }
 0x15b   : > { %v592_v33 = vpop.permute.xlu0 %591 }
 0x15c   : > { %1041 = vmatpush3.msra.mxu1 %v592_v33 }
 0x15d   : > { %1042 = vmatprep.subr.mxu1 %v1172_v12 }
 0x15e   : > { %1043 = vmatpush3.msra.mxu1 %v590_v32 }
 0x15f   : > { %1044 = vmatprep.subr.mxu1 %v1172_v12 }
 0x160   : > { %1045 = vmatpush3.msra.mxu1 %v588_v34 }
 0x161   : > { %1046 = vmatprep.subr.mxu1 %v1172_v12 }
 0x164   : > { %v565_v36 = vpop.permute.xlu1 %564 }
 0x165   : > { %vm566_vm6 = vcmp.lt.s32.totalorder %v556_v41, %v565_v36 }
 0x168   : > { %v560_v39 = vpop.permute.xlu0 %559  ;;  %v586_v40 = vpop.permute.xlu1 %585 }
 0x169   : > { %1047 = vmatpush3.msra.mxu1 %v586_v40  ;;  %vm561_vm5 = vcmp.ge.s32.totalorder %v556_v41, %v560_v39 }
 0x16a   : > { %1048 = vmatprep.subr.mxu1 %v1172_v12  ;;  %vm567_vm7 = vmand %vm561_vm5, %vm566_vm6 }
 0x16b   : > { %v985_v45 = vsel %vm567_vm7, 1.0, %v1172_v12 }
 0x16c   : > { %v584_v42 = vpop.permute.xlu0 %583  ;;  %v582_v43 = vpop.permute.xlu1 %581 }
 0x16d   : > { %1049 = vmatpush3.msra.mxu1 %v584_v42 }
 0x16e   : > { %1050 = vmatprep.subr.mxu1 %v1172_v12 }
 0x16f   : > { %1051 = vmatpush3.msra.mxu1 %v582_v43 }
 0x170   : > { %1052 = vmatprep.subr.mxu1 %v1172_v12  ;;  %v580_v44 = vpop.permute.xlu0 %579 }
 0x171   : > { %1053 = vmatpush3.msra.mxu1 %v580_v44 }
 0x172   : > { %1055 = vmatmul.mubr.msk.f32.vlgmr.msra.gmra.mxu1 %vm603_vm8, %v985_v45 }
 0x231   : > { %683 = sbr.rel (%p987_p5) target bundleno = 966 (0x3c6), region = 64 }
 0x232   : > { %v673_v47 = vpop.f32.mrf.mxu1 }
 0x233   : > { %v677_v48 = vadd.f32 %v673_v47, %v570_v46 }
 0x234   : > { %v1056_v49 = vpop.f32.mrf.mxu1 }
 0x235   : > { %679 = vst.msk [vmem:[#allocation2] sm:$0x3f] %vm678_vm9, %v677_v48 }
 0x236   : > { %v688_v50 = vld [vmem:[%s1359_s3 + $0x18] sm:$0xff]  ;;  %v1175_v51 = vmov 0.0   ;;  %v687_v52 = vld [vmem:[%s1359_s3 + $0x10] sm:$0xff]  ;;  %vm1176_vm10 = vmmov 0   ;;  %v769_v53 = vld [vmem:[%s1363_s7] sm:$0x3] }
 0x237   : > { %1057 = vmatprep.subr.mxu0 %v1175_v51  ;;  %1065 = vmatprep.mubr.msk.f32.mxu0 %vm1176_vm10, %v1175_v51  ;;  %v1177_v54 = vmov 0   ;;  %v686_v55 = vld [vmem:[%s1359_s3 + $0x8] sm:$0xff]  ;;  %v774_v56 = vld [vmem:[%s1364_s8] sm:$0x3]  ;;  %vm786_vm14 = vcmask 1045504   ;;  %vm782_vm15 = vcmask 48128  }
 0x238   : > { %1058 = vmatpush3.msra.mxu0 %v688_v50  ;;  %1105 = vset.pattern.permute.xlu0 %v1177_v54  ;;  %v685_v57 = vld [vmem:[%s1359_s3] sm:$0xff]  ;;  %vm860_vm0 = vcmask 254976  }
 0x239   : > { %1059 = vmatprep.subr.mxu0 %v1175_v51  ;;  %771 = vperm.xlu0 %1105, %v769_v53   ;;  %v988_v61 = vld [vmem:[%s1360_s4] ss:$0 sm:$0xff] }
 0x23a   : > { %1060 = vmatpush3.msra.mxu0 %v687_v52  ;;  %1068 = vmatprep.subr.mxu1 %v1175_v51 }
 0x23b   : > { %1061 = vmatprep.subr.mxu0 %v1175_v51  ;;  %1070 = vmatprep.mubr.msk.f32.mxu1 %vm1176_vm10, %v1175_v51 }
 0x23c   : > { %1062 = vmatpush3.msra.mxu0 %v686_v55  ;;  %v684_v58 = vld [vmem:[#allocation2] sm:$0x3f] }
 0x23d   : > { %1063 = vmatprep.subr.mxu0 %v1175_v51  ;;  %776 = vperm.xlu0 %1105, %v774_v56  }
 0x23e   : > { %1064 = vmatpush3.msra.mxu0 %v685_v57 }
 0x23f   : > { %1066 = vmatmul.mubr.msk.f32.vlgmr.msra.gmra.mxu0 %vm543_vm3, %v684_v58 }
 0x2b4   : > { %v772_v59 = vpop.permute.xlu0 %771 }
 0x2b5   : > { %vm773_vm11 = vcmp.ge.s32.totalorder %v554_v37, %v772_v59 }
 0x2b8   : > { %v777_v60 = vpop.permute.xlu0 %776 }
 0x2b9   : > { %vm778_vm12 = vcmp.lt.s32.totalorder %v554_v37, %v777_v60 }
 0x2ba   : > { %vm779_vm13 = vmand %vm773_vm11, %vm778_vm12 }
 0x2bb   : > { %v990_v1 = vsel %vm779_vm13, 1.0, %v1175_v51 }
 0x2ff   : > { %v765_v62 = vpop.f32.mrf.mxu0 }
 0x300   : > { %v766_v63 = vadd.f32 %v988_v61, %v765_v62 }
 0x301   : > { %v1067_v0 = vpop.f32.mrf.mxu0 }
 0x302   : > { %1069 = vmatpush3.msk.msra.mxu1 %vm786_vm14, %v766_v63 }
 0x303   : > { %1071 = vmatmul.mubr.msk.f32.vlgmr.msra.gmra.mxu1 %vm782_vm15, %v990_v1 }
 0x3c3   : > { %v856_v2 = vpop.f32.mrf.mxu1 }
 0x3c4   : > { %861 = vst.msk [vmem:[#allocation4] sm:$0x3] %vm860_vm0, %v856_v2 }
 0x3c5   : > { %v1072_v3 = vpop.f32.mrf.mxu1 }
 0x3c6 PF: > { %p1081_p6 = scmp.eq.s32.totalorder %s1246_s18, 3  ;;  %s1178_s15 = smov [#allocation2]  }
 0x3c7   : > { %s878_s16 = sshll.u32 %s1178_s15, 4  ;;  %s1179_s19 = smov [#allocation4]   ;;  %s879_s16 = int_to_ptr.vmem [resolvable:$true] %s878_s16 }
 0x3c8   : > { %s889_s20 = sshll.u32 %s1179_s19, 4  ;;  %s1106_s21 = scalar_lea.vmem %s879_s16, 128  ;;  %s890_s20 = int_to_ptr.vmem [resolvable:$true] %s889_s20 }
 0x3c9   : > { %p1107_p7 = scmp.ne.s32.totalorder %s879_s16, %s1106_s21  ;;  %p1113_p10 = scmp.lt.s32.totalorder %s879_s16, %s879_s16 }
 0x3ca   : > { %p1114_p11 = scmp.lt.s32.totalorder %s1106_s21, %s1106_s21 }
 0x3cb   : > { %p1108_p8 = pnand %p1107_p7, %p1081_p6 }
 0x3cc   : > { %p1115_p12 = por %p1114_p11, %p1113_p10 }
 0x3cd   : > { %p1109_p9 = pneg %p1108_p8 }
 0x3cf   : > { %p1116_p13 = pnand %p1115_p12, %p1109_p9 }
 0x3d1   : > { %1119 = shalt.err (!%p1116_p13)
}
 0x3d2   : > { %1074 = dma.vmem_to_hbm [thread:$0]  (%p1081_p6), %s879_s16, 128, %s1366_s10, [#allocation3]  }
 0x3d3   : > { %s1130_s24 = scalar_lea.vmem %s890_s20, 32  ;;  %p1137_p3 = scmp.lt.s32.totalorder %s890_s20, %s890_s20 }
 0x3d4   : > { %p1131_p0 = scmp.ne.s32.totalorder %s890_s20, %s1130_s24  ;;  %p1138_p4 = scmp.lt.s32.totalorder %s1130_s24, %s1130_s24 }
 0x3d6   : > { %p1132_p1 = pnand %p1131_p0, %p1081_p6  ;;  %p1139_p5 = por %p1138_p4, %p1137_p3 }
 0x3d8   : > { %p1133_p2 = pneg %p1132_p1 }
 0x3da   : > { %p1140_p7 = pnand %p1139_p5, %p1133_p2 }
 0x3dc   : > { %1143 = shalt.err (!%p1140_p7)
}
 0x3dd   : > { %1076 = dma.vmem_to_hbm [thread:$0]  (%p1081_p6), %s890_s20, 32, %s1367_s11, [#allocation5]  }
 0x3de   : > { %1159 = dma.done.wait (%p1081_p6), [#allocation3], 128  }
 0x3df   : > { %1161 = vsyncadd (%p1081_p6), [#allocation3], 4294967168 }
 0x3e0   : > { %1163 = dma.done.wait (%p1081_p6), [#allocation5], 32  }
 0x3e1   : > { %1165 = vsyncadd (%p1081_p6), [#allocation5], 4294967264 }
 0x3e2 PF: > { %s24_s17 = sadd.s32 1, %s1168_s17  }
 0x3e3   : > { %p21_p8 = scmp.ge.s32.totalorder %s24_s17, 6  }
 0x3e5   :  { %23 = sbr.rel (!%p21_p8) target bundleno = 2 (0x2), region = 111 }
 0x3ea   :  { %914 = vsyncpa [#allocation3], 1 }
 0x3eb   :  { %916 = vsyncpa [#allocation3 + $0x1], 1 }
 0x3ec   :  { %917 = vsyncpa [#allocation5], 1 }

</bundles_post_ra>
